<compile_context>
chip_gen: v7x
topology: tpu7x:2x2x1
jax: 0.10.0
libtpu: 0.0.40
codegen_flags: <defaults>
</compile_context>

<pallas_src>
import jax
import jax.numpy as jnp
from jax.experimental import pallas as pl
from jax.experimental.pallas import tpu as pltpu


def mlp_q_kernel(obs_ref, act_ref, w1o_ref, w1a_ref, b1_ref,
                 w2_ref, b2_ref, w3_ref, b3_ref, o_ref):
    """One batch tile of the Q-function MLP, producing a lane-dense (1, bt) row."""
    # Layer 1 -- concat fused: [obs, act] @ W1 == obs @ W1[:obs_dim] + act @ W1[obs_dim:]
    h = jnp.dot(obs_ref[...], w1o_ref[...], preferred_element_type=jnp.float32)
    h = h + jnp.dot(act_ref[...], w1a_ref[...], preferred_element_type=jnp.float32)
    h = jnp.maximum(h + b1_ref[...], 0.0)                              # ReLU
    # Layer 2
    h = jnp.dot(h, w2_ref[...], preferred_element_type=jnp.float32) + b2_ref[...]
    h = jnp.maximum(h, 0.0)                                            # ReLU
    # Layer 3 (output feature dim = 1): contract the hidden dim of h against the
    # (1, h2) weight row, giving a lane-dense (1, bt) result directly (no [bt, 1]
    # column + masked stores).
    q = jax.lax.dot_general(
        w3_ref[...], h,
        dimension_numbers=(((1,), (1,)), ((), ())),
        preferred_element_type=jnp.float32)                            # (1, bt)
    o_ref[...] = (q + b3_ref[...]).astype(o_ref.dtype)


def mlp_q_forward(obs, act, params, *, batch_tile=256):
    """obs: [B, obs_dim], act: [B, act_dim] -> q: [B]  (matches torch.squeeze(q, -1))."""
    (w1, b1), (w2, b2), (w3, b3) = params
    B, obs_dim = obs.shape
    act_dim = act.shape[1]
    h1 = w1.shape[1]
    h2 = w2.shape[1]

    # Split W1 so the concat is fused into the kernel; present w3 as a (1, h2) row.
    w1_obs = w1[:obs_dim]
    w1_act = w1[obs_dim:]
    w3_row = w3.reshape(1, h2)

    # Lane-aligned batch tiling with zero-padding for arbitrary B.
    bt = max(128, (batch_tile // 128) * 128)          # tile is a multiple of 128
    b_ceil = ((B + 127) // 128) * 128
    bt = min(bt, b_ceil)                              # don't over-tile tiny batches
    num_tiles = pl.cdiv(B, bt)
    b_pad = num_tiles * bt
    if b_pad != B:
        pad = b_pad - B
        obs = jnp.pad(obs, ((0, pad), (0, 0)))
        act = jnp.pad(act, ((0, pad), (0, 0)))

    # Weights/biases use constant index maps -> same block every step, so Pallas keeps
    # them resident in VMEM (no per-step re-DMA). Batch axis is "parallel" so v7x can
    # shard grid steps across its two TensorCores.
    q_row = pl.pallas_call(
        mlp_q_kernel,
        out_shape=jax.ShapeDtypeStruct((1, b_pad), jnp.float32),
        grid_spec=pltpu.PrefetchScalarGridSpec(
            num_scalar_prefetch=0,
            grid=(num_tiles,),
            in_specs=[
                pl.BlockSpec((bt, obs_dim), lambda i: (i, 0)),   # obs tile
                pl.BlockSpec((bt, act_dim), lambda i: (i, 0)),   # act tile
                pl.BlockSpec((obs_dim, h1), lambda i: (0, 0)),   # W1[:obs_dim]
                pl.BlockSpec((act_dim, h1), lambda i: (0, 0)),   # W1[obs_dim:]
                pl.BlockSpec((1, h1), lambda i: (0, 0)),         # b1
                pl.BlockSpec((h1, h2), lambda i: (0, 0)),        # W2
                pl.BlockSpec((1, h2), lambda i: (0, 0)),         # b2
                pl.BlockSpec((1, h2), lambda i: (0, 0)),         # w3 (as a row)
                pl.BlockSpec((1, 1), lambda i: (0, 0)),          # b3
            ],
            out_specs=pl.BlockSpec((1, bt), lambda i: (0, i)),   # lane-dense output slab
        ),
        compiler_params=pltpu.CompilerParams(
            dimension_semantics=("parallel",)),
    )(obs, act, w1_obs, w1_act, b1, w2, b2, w3_row, b3)

    return q_row.reshape(b_pad)[:B]                              # [B]


def init_params(key, obs_dim, act_dim, hidden_sizes):
    """Deterministic init mimicking nn.Linear default (uniform +/- 1/sqrt(fan_in))."""
    sizes = [obs_dim + act_dim] + list(hidden_sizes) + [1]
    params = []
    for j in range(len(sizes) - 1):
        key, kw, kb = jax.random.split(key, 3)
        fan_in, fan_out = sizes[j], sizes[j + 1]
        bound = 1.0 / jnp.sqrt(fan_in)
        w = jax.random.uniform(kw, (fan_in, fan_out), jnp.float32, -bound, bound)
        b = jax.random.uniform(kb, (1, fan_out), jnp.float32, -bound, bound)
        params.append((w, b))
    return params


def mlp_q_reference(obs, act, params):
    (w1, b1), (w2, b2), (w3, b3) = params
    x = jnp.concatenate([obs, act], axis=-1)
    h = jnp.maximum(x @ w1 + b1, 0.0)
    h = jnp.maximum(h @ w2 + b2, 0.0)
    q = h @ w3 + b3
    return jnp.squeeze(q, -1)


if __name__ == "__main__":
    # Shapes consistent with the module's docstring example (cat -> [100, 23]);
    # B=100 also exercises the padding / non-divisible-batch path.
    batch, obs_dim, act_dim = 100, 17, 6
    hidden_sizes = (32, 32)

    key = jax.random.PRNGKey(0)
    k_obs, k_act, k_par = jax.random.split(key, 3)
    obs = jax.random.normal(k_obs, (batch, obs_dim), jnp.float32)
    act = jax.random.normal(k_act, (batch, act_dim), jnp.float32)
    params = init_params(k_par, obs_dim, act_dim, hidden_sizes)

    q = mlp_q_forward(obs, act, params, batch_tile=256)
    q = jax.block_until_ready(q)

    q_ref = mlp_q_reference(obs, act, params)
    assert q.shape == (batch,), q.shape
    assert jnp.allclose(q, q_ref, atol=1e-5, rtol=1e-5), (q, q_ref)

    print("KERNEL_OK")
</pallas_src>

<mosaic_0001>
module attributes {stable_mosaic.version = 11 : i64} {
  func.func @mlp_q_kernel(%arg0: i32, %arg1: memref<128x17xf32, #tpu.memory_space<vmem>>, %arg2: memref<128x6xf32, #tpu.memory_space<vmem>>, %arg3: memref<17x32xf32, #tpu.memory_space<vmem>>, %arg4: memref<6x32xf32, #tpu.memory_space<vmem>>, %arg5: memref<1x32xf32, #tpu.memory_space<vmem>>, %arg6: memref<32x32xf32, #tpu.memory_space<vmem>>, %arg7: memref<1x32xf32, #tpu.memory_space<vmem>>, %arg8: memref<1x32xf32, #tpu.memory_space<vmem>>, %arg9: memref<1x1xf32, #tpu.memory_space<vmem>>, %arg10: memref<1x128xf32, #tpu.memory_space<vmem>>) attributes {dimension_semantics = [#tpu.dimension_semantics<parallel>], iteration_bounds = array<i64: 1>, scalar_prefetch = 0 : i64, scratch_operands = 0 : i64, tpu.core_type = #tpu.core_type<tc>, window_params = [{transform_indices = @transform_0, window_bounds = array<i64: 128, 17>}, {transform_indices = @transform_1, window_bounds = array<i64: 128, 6>}, {pipeline_mode = #tpu.pipeline_mode<synchronous>, transform_indices = @transform_2, window_bounds = array<i64: 17, 32>}, {pipeline_mode = #tpu.pipeline_mode<synchronous>, transform_indices = @transform_3, window_bounds = array<i64: 6, 32>}, {pipeline_mode = #tpu.pipeline_mode<synchronous>, transform_indices = @transform_4, window_bounds = array<i64: 1, 32>}, {pipeline_mode = #tpu.pipeline_mode<synchronous>, transform_indices = @transform_5, window_bounds = array<i64: 32, 32>}, {pipeline_mode = #tpu.pipeline_mode<synchronous>, transform_indices = @transform_6, window_bounds = array<i64: 1, 32>}, {pipeline_mode = #tpu.pipeline_mode<synchronous>, transform_indices = @transform_7, window_bounds = array<i64: 1, 32>}, {pipeline_mode = #tpu.pipeline_mode<synchronous>, transform_indices = @transform_8, window_bounds = array<i64: 1, 1>}, {transform_indices = @transform_9, window_bounds = array<i64: 1, 128>}]} {
    %c0 = arith.constant 0 : index
    %c0_0 = arith.constant 0 : index
    %0 = vector.load %arg1[%c0, %c0_0] : memref<128x17xf32, #tpu.memory_space<vmem>>, vector<128x17xf32>
    %c0_1 = arith.constant 0 : index
    %c0_2 = arith.constant 0 : index
    %1 = vector.load %arg3[%c0_1, %c0_2] : memref<17x32xf32, #tpu.memory_space<vmem>>, vector<17x32xf32>
    %cst = arith.constant dense<0.000000e+00> : vector<128x32xf32>
    %2 = tpu.matmul %0, %1, %cst {dimension_numbers = #tpu.dot_dimension_numbers<[1], [0], [0], [1], [0, 0, 1, 1], [], []>} : vector<128x17xf32>, vector<17x32xf32>, vector<128x32xf32> -> vector<128x32xf32>
    %c0_3 = arith.constant 0 : index
    %c0_4 = arith.constant 0 : index
    %3 = vector.load %arg2[%c0_3, %c0_4] : memref<128x6xf32, #tpu.memory_space<vmem>>, vector<128x6xf32>
    %c0_5 = arith.constant 0 : index
    %c0_6 = arith.constant 0 : index
    %4 = vector.load %arg4[%c0_5, %c0_6] : memref<6x32xf32, #tpu.memory_space<vmem>>, vector<6x32xf32>
    %cst_7 = arith.constant dense<0.000000e+00> : vector<128x32xf32>
    %5 = tpu.matmul %3, %4, %cst_7 {dimension_numbers = #tpu.dot_dimension_numbers<[1], [0], [0], [1], [0, 0, 1, 1], [], []>} : vector<128x6xf32>, vector<6x32xf32>, vector<128x32xf32> -> vector<128x32xf32>
    %6 = arith.addf %2, %5 : vector<128x32xf32>
    %c0_8 = arith.constant 0 : index
    %c0_9 = arith.constant 0 : index
    %7 = vector.load %arg5[%c0_8, %c0_9] : memref<1x32xf32, #tpu.memory_space<vmem>>, vector<1x32xf32>
    %8 = vector.broadcast %7 : vector<1x32xf32> to vector<128x32xf32>
    %9 = arith.addf %6, %8 : vector<128x32xf32>
    %cst_10 = arith.constant 0.000000e+00 : f32
    %10 = vector.broadcast %cst_10 : f32 to vector<128x32xf32>
    %11 = arith.maximumf %9, %10 : vector<128x32xf32>
    %c0_11 = arith.constant 0 : index
    %c0_12 = arith.constant 0 : index
    %12 = vector.load %arg6[%c0_11, %c0_12] : memref<32x32xf32, #tpu.memory_space<vmem>>, vector<32x32xf32>
    %cst_13 = arith.constant dense<0.000000e+00> : vector<128x32xf32>
    %13 = tpu.matmul %11, %12, %cst_13 {dimension_numbers = #tpu.dot_dimension_numbers<[1], [0], [0], [1], [0, 0, 1, 1], [], []>} : vector<128x32xf32>, vector<32x32xf32>, vector<128x32xf32> -> vector<128x32xf32>
    %c0_14 = arith.constant 0 : index
    %c0_15 = arith.constant 0 : index
    %14 = vector.load %arg7[%c0_14, %c0_15] : memref<1x32xf32, #tpu.memory_space<vmem>>, vector<1x32xf32>
    %15 = vector.broadcast %14 : vector<1x32xf32> to vector<128x32xf32>
    %16 = arith.addf %13, %15 : vector<128x32xf32>
    %cst_16 = arith.constant 0.000000e+00 : f32
    %17 = vector.broadcast %cst_16 : f32 to vector<128x32xf32>
    %18 = arith.maximumf %16, %17 : vector<128x32xf32>
    %c0_17 = arith.constant 0 : index
    %c0_18 = arith.constant 0 : index
    %19 = vector.load %arg8[%c0_17, %c0_18] : memref<1x32xf32, #tpu.memory_space<vmem>>, vector<1x32xf32>
    %cst_19 = arith.constant dense<0.000000e+00> : vector<1x128xf32>
    %20 = tpu.matmul %19, %18, %cst_19 {dimension_numbers = #tpu.dot_dimension_numbers<[1], [1], [0], [0], [0, 0, 1, 0], [], []>} : vector<1x32xf32>, vector<128x32xf32>, vector<1x128xf32> -> vector<1x128xf32>
    %c0_20 = arith.constant 0 : index
    %c0_21 = arith.constant 0 : index
    %21 = vector.load %arg9[%c0_20, %c0_21] : memref<1x1xf32, #tpu.memory_space<vmem>>, vector<1x1xf32>
    %22 = vector.broadcast %21 : vector<1x1xf32> to vector<1x128xf32>
    %23 = arith.addf %20, %22 : vector<1x128xf32>
    %c0_22 = arith.constant 0 : index
    %c0_23 = arith.constant 0 : index
    %24 = vector.load %arg10[%c0_22, %c0_23] : memref<1x128xf32, #tpu.memory_space<vmem>>, vector<1x128xf32>
    tpu.vector_store %arg10[%c0_22, %c0_23], %23 {strides = array<i32>} : memref<1x128xf32, #tpu.memory_space<vmem>>, vector<1x128xf32>,
    return
  }
  func.func @transform_0(%arg0: i32) -> (i32, i32) {
    %c0_i32 = arith.constant 0 : i32
    %c0_i32_0 = arith.constant 0 : i32
    return %arg0, %c0_i32 : i32, i32
  }
  func.func @transform_1(%arg0: i32) -> (i32, i32) {
    %c0_i32 = arith.constant 0 : i32
    %c0_i32_0 = arith.constant 0 : i32
    return %arg0, %c0_i32 : i32, i32
  }
  func.func @transform_2(%arg0: i32) -> (i32, i32) {
    %c0_i32 = arith.constant 0 : i32
    %c0_i32_0 = arith.constant 0 : i32
    %c0_i32_1 = arith.constant 0 : i32
    return %c0_i32, %c0_i32_0 : i32, i32
  }
  func.func @transform_3(%arg0: i32) -> (i32, i32) {
    %c0_i32 = arith.constant 0 : i32
    %c0_i32_0 = arith.constant 0 : i32
    %c0_i32_1 = arith.constant 0 : i32
    return %c0_i32, %c0_i32_0 : i32, i32
  }
  func.func @transform_4(%arg0: i32) -> (i32, i32) {
    %c0_i32 = arith.constant 0 : i32
    %c0_i32_0 = arith.constant 0 : i32
    %c0_i32_1 = arith.constant 0 : i32
    return %c0_i32, %c0_i32_0 : i32, i32
  }
  func.func @transform_5(%arg0: i32) -> (i32, i32) {
    %c0_i32 = arith.constant 0 : i32
    %c0_i32_0 = arith.constant 0 : i32
    %c0_i32_1 = arith.constant 0 : i32
    return %c0_i32, %c0_i32_0 : i32, i32
  }
  func.func @transform_6(%arg0: i32) -> (i32, i32) {
    %c0_i32 = arith.constant 0 : i32
    %c0_i32_0 = arith.constant 0 : i32
    %c0_i32_1 = arith.constant 0 : i32
    return %c0_i32, %c0_i32_0 : i32, i32
  }
  func.func @transform_7(%arg0: i32) -> (i32, i32) {
    %c0_i32 = arith.constant 0 : i32
    %c0_i32_0 = arith.constant 0 : i32
    %c0_i32_1 = arith.constant 0 : i32
    return %c0_i32, %c0_i32_0 : i32, i32
  }
  func.func @transform_8(%arg0: i32) -> (i32, i32) {
    %c0_i32 = arith.constant 0 : i32
    %c0_i32_0 = arith.constant 0 : i32
    %c0_i32_1 = arith.constant 0 : i32
    return %c0_i32, %c0_i32_0 : i32, i32
  }
  func.func @transform_9(%arg0: i32) -> (i32, i32) {
    %c0_i32 = arith.constant 0 : i32
    %c0_i32_0 = arith.constant 0 : i32
    return %c0_i32, %arg0 : i32, i32
  }
}

</mosaic_0001>

<bundles_post_ra>
// kernel: tpu_custom_call.1
= control target key start
LH: loop header
LB: loop body
LE: loop exit
PB: predicated region body
PF: predicated region fallthrough
CT: control target
= control target key end

     0   :  { %s1507_s0 = inlined_call_operand.vmem [shape: f32[128,17], index: 0, kind: input, shape index: {}]   ;;  %s1508_s1 = inlined_call_operand.vmem [shape: f32[128,6], index: 1, kind: input, shape index: {}]   ;;  %s1509_s2 = inlined_call_operand.vmem [shape: f32[17,32], index: 2, kind: input, shape index: {}]   ;;  %s1510_s3 = inlined_call_operand.vmem [shape: f32[6,32], index: 3, kind: input, shape index: {}]   ;;  %s1511_s4 = inlined_call_operand.vmem [shape: f32[1,32], index: 4, kind: input, shape index: {}]   ;;  %s1512_s5 = inlined_call_operand.vmem [shape: f32[32,32], index: 5, kind: input, shape index: {}]   ;;  %s1513_s6 = inlined_call_operand.vmem [shape: f32[1,32], index: 6, kind: input, shape index: {}]   ;;  %s1514_s7 = inlined_call_operand.vmem [shape: f32[1,32], index: 7, kind: input, shape index: {}]   ;;  %s1515_s8 = inlined_call_operand.<no memory space> [shape: f32[1,1], index: 8, kind: input, shape index: {}]   ;;  %s1516_s9 = inlined_call_operand.hbm [shape: f32[1,128], index: 9, kind: output, shape index: {}]  }
   0x1   :  { %v14_v0 = vstv %s1515_s8 }
   0x2   :  { %15 = vst [vmem:[#allocation2] sm:$0x1] %v14_v0 }
   0x3   :  { %v70_v1 = vld [vmem:[%s1510_s3] sm:$0x3f]  ;;  %vm120_vm0 = vcmask 1045504   ;;  %vm71_vm1 = vcmask 48128   ;;  %v55_v3 = vld [vmem:[%s1508_s1 + $0x8] sm:$0xff]  ;;  %v56_v6 = vld [vmem:[%s1508_s1 + $0x10] sm:$0xff] }
   0x4   :  { %v54_v2 = vld [vmem:[%s1508_s1] sm:$0xff]  ;;  %1016 = vmatprep.subr.msk.mxu0 %vm120_vm0, %v70_v1  ;;  %v52_v5 = vld [vmem:[%s1509_s2 + $0x8] sm:$0xff]  ;;  %vm318_vm2 = vcmask 1040384   ;;  %v57_v8 = vld [vmem:[%s1508_s1 + $0x18] sm:$0xff] }
   0x5   :  { %1018 = vmatprep.mubr.msk.f32.mxu0 %vm71_vm1, %v54_v2  ;;  %v51_v4 = vld [vmem:[%s1509_s2] sm:$0xff]  ;;  %1017 = vmatpush3.msk.msra.mxu0 %vm120_vm0, %v70_v1  ;;  %v53_v9 = vld [vmem:[%s1509_s2 + $0x10] sm:$0x1]  ;;  %v59_v11 = vld [vmem:[%s1508_s1 + $0x28] sm:$0xff] }
   0x6   :  { %v1139_v7 = vpack.c.bf16 %v52_v5, %v51_v4  ;;  %1019 = vmatmul.mubr.msk.f32.vlgmr.msra.gmra.mrb[0].mxu0 %vm71_vm1, %v55_v3  ;;  %v58_v10 = vld [vmem:[%s1508_s1 + $0x20] sm:$0xff]  ;;  %v60_v12 = vld [vmem:[%s1508_s1 + $0x30] sm:$0xff]  ;;  %v61_v13 = vld [vmem:[%s1508_s1 + $0x38] sm:$0xff] }
   0x7   :  { %1021 = vmatprep.mubr.msk.f32.mxu0 %vm71_vm1, %v56_v6  ;;  %v506_v14 = vld [vmem:[%s1512_s5] sm:$0xff]  ;;  %v507_v15 = vld [vmem:[%s1512_s5 + $0x8] sm:$0xff] }
   0x8   :  { %1140 = vmatprep.subr.bf16.mxu0 %v1139_v7 }
   0x9   :  { %1142 = vmatpush3.bf16.msra.mxu0 %v1139_v7 }
   0xa   :  { %1046 = vmatprep.subr.msk.mxu0 %vm318_vm2, %v53_v9  ;;  %1022 = vmatmul.mubr.msk.f32.gmra.mrb[2].mxu0 %vm71_vm1, %v57_v8 }
   0xb   :  { %1024 = vmatprep.mubr.msk.f32.mxu0 %vm71_vm1, %v58_v10 }
   0xd   :  { %1047 = vmatpush3.msk.msra.mxu0 %vm318_vm2, %v53_v9 }
   0xe   :  { %1025 = vmatmul.mubr.msk.f32.gmra.mrb[4].mxu0 %vm71_vm1, %v59_v11 }
   0xf   :  { %1027 = vmatprep.mubr.msk.f32.mxu0 %vm71_vm1, %v60_v12 }
  0x10   :  { %16 = vsyncpa [#allocation4], 0  ;;  %v62_v16 = vld [vmem:[%s1508_s1 + $0x40] sm:$0xff]  ;;  %v1143_v17 = vpack.c.bf16 %v507_v15, %v506_v14  ;;  %v63_v18 = vld [vmem:[%s1508_s1 + $0x48] sm:$0xff]  ;;  %vm269_vm3 = vcmask 138240   ;;  %vm517_vm4 = vcmask 261120  }
  0x11   :  { %v64_v19 = vld [vmem:[%s1508_s1 + $0x50] sm:$0xff]  ;;  %v65_v20 = vld [vmem:[%s1508_s1 + $0x58] sm:$0xff]  ;;  %v66_v21 = vld [vmem:[%s1508_s1 + $0x60] sm:$0xff]  ;;  %vm1230_vm5 = vmmov 0   ;;  %s1233_s18 = smov [#allocation3]  }
  0x12   :  { %1028 = vmatmul.mubr.msk.f32.gmra.mrb[6].mxu0 %vm71_vm1, %v61_v13  ;;  %1144 = vmatprep.subr.bf16.mxu1 %v1143_v17  ;;  %v67_v22 = vld [vmem:[%s1508_s1 + $0x68] sm:$0xff]  ;;  %v68_v23 = vld [vmem:[%s1508_s1 + $0x70] sm:$0xff]  ;;  %v69_v24 = vld [vmem:[%s1508_s1 + $0x78] sm:$0xff]  ;;  %s866_s19 = sshll.u32 %s1233_s18, 4  ;;  %s867_s19 = int_to_ptr.vmem [resolvable:$true] %s866_s19 }
  0x13   :  { %1030 = vmatprep.mubr.msk.f32.mxu0 %vm71_vm1, %v62_v16  ;;  %1146 = vmatpush3.bf16.msra.mxu1 %v1143_v17  ;;  %v35_v25 = vld [vmem:[%s1507_s0] sm:$0xff]  ;;  %v36_v26 = vld [vmem:[%s1507_s0 + $0x8] sm:$0xff]  ;;  %v37_v27 = vld [vmem:[%s1507_s0 + $0x10] sm:$0xff]  ;;  %s1205_s3 = scalar_lea.vmem %s867_s19, 16  ;;  %s1209_s20 = scalar_lea.vmem %s867_s19, 32 }
  0x14   :  { %v38_v28 = vld [vmem:[%s1507_s0 + $0x18] sm:$0xff]  ;;  %v39_v29 = vld [vmem:[%s1507_s0 + $0x20] sm:$0xff]  ;;  %v40_v30 = vld [vmem:[%s1507_s0 + $0x28] sm:$0xff]  ;;  %p1206_p0 = scmp.ne.s32.totalorder %s867_s19, %s1205_s3  ;;  %p1210_p1 = scmp.lt.s32.totalorder %s867_s19, %s867_s19 }
  0x15   :  { %v41_v31 = vld [vmem:[%s1507_s0 + $0x30] sm:$0xff]  ;;  %v42_v32 = vld [vmem:[%s1507_s0 + $0x38] sm:$0xff]  ;;  %v43_v33 = vld [vmem:[%s1507_s0 + $0x40] sm:$0xff]  ;;  %p1211_p2 = scmp.lt.s32.totalorder %s1209_s20, %s1205_s3 }
  0x16   :  { %1031 = vmatmul.mubr.msk.f32.gmra.mrb[8].mxu0 %vm71_vm1, %v63_v18  ;;  %v44_v34 = vld [vmem:[%s1507_s0 + $0x48] sm:$0xff]  ;;  %v45_v35 = vld [vmem:[%s1507_s0 + $0x50] sm:$0xff]  ;;  %v46_v36 = vld [vmem:[%s1507_s0 + $0x58] sm:$0xff] }
  0x17   :  { %1033 = vmatprep.mubr.msk.f32.mxu0 %vm71_vm1, %v64_v19  ;;  %v47_v37 = vld [vmem:[%s1507_s0 + $0x60] sm:$0xff]  ;;  %v48_v38 = vld [vmem:[%s1507_s0 + $0x68] sm:$0xff]  ;;  %v49_v39 = vld [vmem:[%s1507_s0 + $0x70] sm:$0xff]  ;;  %p1212_p3 = por %p1211_p2, %p1210_p1 }
  0x18   :  { %v50_v40 = vld [vmem:[%s1507_s0 + $0x78] sm:$0xff]  ;;  %v508_v41 = vld [vmem:[%s1512_s5 + $0x10] sm:$0xff]  ;;  %v908_v44 = vld [vmem:[%s1511_s4] ss:$0 sm:$0xff] }
  0x19   :  { %v509_v42 = vld [vmem:[%s1512_s5 + $0x18] sm:$0xff]  ;;  %vm1464_vm6 = vmpackc.low %vm517_vm4, %vm517_vm4  ;;  %p1213_p4 = pnand %p1212_p3, %p1206_p0 }
  0x1a   :  { %1034 = vmatmul.mubr.msk.f32.gmra.mrb[10].mxu0 %vm71_vm1, %v65_v20  ;;  %v1147_v43 = vpack.c.bf16 %v509_v42, %v508_v41 }
  0x1b   :  { %1036 = vmatprep.mubr.msk.f32.mxu0 %vm71_vm1, %v66_v21 }
  0x1c   :  { %1148 = vmatprep.subr.bf16.mxu1 %v1147_v43 }
  0x1d   :  { %1150 = vmatpush3.bf16.msra.mxu1 %v1147_v43 }
  0x1e   :  { %1037 = vmatmul.mubr.msk.f32.gmra.mrb[12].mxu0 %vm71_vm1, %v67_v22 }
  0x1f   :  { %1039 = vmatprep.mubr.msk.f32.mxu0 %vm71_vm1, %v68_v23 }
  0x22   :  { %1040 = vmatmul.mubr.msk.f32.gmra.mrb[14].mxu0 %vm71_vm1, %v69_v24 }
  0x23   :  { %1048 = vmatprep.mubr.msk.f32.mxu0 %vm269_vm3, %v35_v25 }
  0x26   :  { %1049 = vmatmul.mubr.msk.f32.vlgmr.msra.gmra.mrb[0].mxu0 %vm269_vm3, %v36_v26 }
  0x27   :  { %1051 = vmatprep.mubr.msk.f32.mxu0 %vm269_vm3, %v37_v27 }
  0x2a   :  { %1052 = vmatmul.mubr.msk.f32.gmra.mrb[2].mxu0 %vm269_vm3, %v38_v28 }
  0x2b   :  { %1054 = vmatprep.mubr.msk.f32.mxu0 %vm269_vm3, %v39_v29  ;;  %v1229_v29 = vmov 0.0|0.0  }
  0x2c   :  { %1151 = vmatprep.subr.bf16.mxu1 %v1229_v29 }
  0x2e   :  { %1055 = vmatmul.mubr.msk.f32.gmra.mrb[4].mxu0 %vm269_vm3, %v40_v30  ;;  %v1231_v30 = vmov 0.0  }
  0x2f   :  { %1057 = vmatprep.mubr.msk.f32.mxu0 %vm269_vm3, %v41_v31  ;;  %v728_v31 = vld [vmem:[#allocation2] sm:$0x1] }
  0x32   :  { %1058 = vmatmul.mubr.msk.f32.gmra.mrb[6].mxu0 %vm269_vm3, %v42_v32  ;;  %v1232_v32 = vmov 0  }
  0x33   :  { %1060 = vmatprep.mubr.msk.f32.mxu0 %vm269_vm3, %v43_v33  ;;  %1204 = vset.pattern.permute.xlu0 %v1232_v32  ;;  %v909_v33 = vld [vmem:[%s1513_s6] ss:$0 sm:$0xff] }
  0x34   :  { %731 = vperm.xlu0 %1204, %v728_v31  }
  0x36   :  { %1061 = vmatmul.mubr.msk.f32.gmra.mrb[8].mxu0 %vm269_vm3, %v44_v34 }
  0x37   :  { %1063 = vmatprep.mubr.msk.f32.mxu0 %vm269_vm3, %v45_v35 }
  0x3a   :  { %1064 = vmatmul.mubr.msk.f32.gmra.mrb[10].mxu0 %vm269_vm3, %v46_v36 }
  0x3b   :  { %1066 = vmatprep.mubr.msk.f32.mxu0 %vm269_vm3, %v47_v37 }
  0x3e   :  { %1067 = vmatmul.mubr.msk.f32.gmra.mrb[12].mxu0 %vm269_vm3, %v48_v38 }
  0x3f   :  { %1069 = vmatprep.mubr.msk.f32.mxu0 %vm269_vm3, %v49_v39 }
  0x42   :  { %1070 = vmatmul.mubr.msk.f32.gmra.mrb[14].mxu0 %vm269_vm3, %v50_v40 }
  0xb3   :  { %v732_v32 = vpop.permute.xlu0 %731 }
  0xf9   :  { %v1050_v45 = vpop.f32.mrb[0].mxu0 }
  0xfa   :  { %v475_v46 = vadd.f32 %v1050_v45, %v908_v44  ;;  %v388_v47 = vpop.f32.mrb[1].mxu0 }
  0xfb   :  { %v474_v48 = vadd.f32 %v908_v44, %v388_v47 }
  0xfc   :  { %v491_v51 = vmax.f32 %v475_v46, 0.0 }
  0xfd   :  { %v490_v49 = vmax.f32 %v474_v48, 0.0  ;;  %v1053_v50 = vpop.f32.mrb[2].mxu0 }
  0xfe   :  { %v477_v52 = vadd.f32 %v1053_v50, %v908_v44  ;;  %v398_v53 = vpop.f32.mrb[3].mxu0 }
  0xff   :  { %v476_v54 = vadd.f32 %v908_v44, %v398_v53  ;;  %1080 = vmatprep.mubr.msk.f32.mxu1 %vm517_vm4, %v490_v49 }
 0x100   :  { %1081 = vmatmul.mubr.msk.f32.vlgmr.msra.gmra.mrb[0].mxu1 %vm517_vm4, %v491_v51  ;;  %v493_v57 = vmax.f32 %v477_v52, 0.0 }
 0x101   :  { %v492_v55 = vmax.f32 %v476_v54, 0.0  ;;  %v1056_v56 = vpop.f32.mrb[4].mxu0 }
 0x102   :  { %v479_v58 = vadd.f32 %v1056_v56, %v908_v44  ;;  %v408_v59 = vpop.f32.mrb[5].mxu0 }
 0x103   :  { %v478_v60 = vadd.f32 %v908_v44, %v408_v59  ;;  %1083 = vmatprep.mubr.msk.f32.mxu1 %vm517_vm4, %v492_v55 }
 0x104   :  { %1084 = vmatmul.mubr.msk.f32.gmra.mrb[2].mxu1 %vm517_vm4, %v493_v57  ;;  %v495_v63 = vmax.f32 %v479_v58, 0.0 }
 0x105   :  { %v494_v61 = vmax.f32 %v478_v60, 0.0  ;;  %v1059_v62 = vpop.f32.mrb[6].mxu0 }
 0x106   :  { %v481_v0 = vadd.f32 %v1059_v62, %v908_v44  ;;  %v418_v1 = vpop.f32.mrb[7].mxu0 }
 0x107   :  { %v480_v2 = vadd.f32 %v908_v44, %v418_v1  ;;  %1086 = vmatprep.mubr.msk.f32.mxu1 %vm517_vm4, %v494_v61 }
 0x108   :  { %1087 = vmatmul.mubr.msk.f32.gmra.mrb[4].mxu1 %vm517_vm4, %v495_v63  ;;  %v497_v5 = vmax.f32 %v481_v0, 0.0 }
 0x109   :  { %v496_v3 = vmax.f32 %v480_v2, 0.0  ;;  %v1062_v4 = vpop.f32.mrb[8].mxu0 }
 0x10a   :  { %v483_v6 = vadd.f32 %v1062_v4, %v908_v44  ;;  %v428_v7 = vpop.f32.mrb[9].mxu0 }
 0x10b   :  { %v482_v8 = vadd.f32 %v908_v44, %v428_v7  ;;  %1089 = vmatprep.mubr.msk.f32.mxu1 %vm517_vm4, %v496_v3 }
 0x10c   :  { %1090 = vmatmul.mubr.msk.f32.gmra.mrb[6].mxu1 %vm517_vm4, %v497_v5  ;;  %v499_v11 = vmax.f32 %v483_v6, 0.0 }
 0x10d   :  { %v498_v9 = vmax.f32 %v482_v8, 0.0  ;;  %v1065_v10 = vpop.f32.mrb[10].mxu0 }
 0x10e   :  { %v485_v12 = vadd.f32 %v1065_v10, %v908_v44  ;;  %v438_v13 = vpop.f32.mrb[11].mxu0 }
 0x10f   :  { %v484_v14 = vadd.f32 %v908_v44, %v438_v13  ;;  %1092 = vmatprep.mubr.msk.f32.mxu1 %vm517_vm4, %v498_v9 }
 0x110   :  { %1093 = vmatmul.mubr.msk.f32.gmra.mrb[8].mxu1 %vm517_vm4, %v499_v11  ;;  %v501_v17 = vmax.f32 %v485_v12, 0.0 }
 0x111   :  { %v500_v15 = vmax.f32 %v484_v14, 0.0  ;;  %v1068_v16 = vpop.f32.mrb[12].mxu0 }
 0x112   :  { %v487_v18 = vadd.f32 %v1068_v16, %v908_v44  ;;  %v448_v19 = vpop.f32.mrb[13].mxu0 }
 0x113   :  { %v486_v20 = vadd.f32 %v908_v44, %v448_v19  ;;  %1095 = vmatprep.mubr.msk.f32.mxu1 %vm517_vm4, %v500_v15 }
 0x114   :  { %1096 = vmatmul.mubr.msk.f32.gmra.mrb[10].mxu1 %vm517_vm4, %v501_v17  ;;  %v503_v23 = vmax.f32 %v487_v18, 0.0 }
 0x115   :  { %v502_v21 = vmax.f32 %v486_v20, 0.0  ;;  %v1071_v22 = vpop.f32.mrb[14].mxu0 }
 0x116   :  { %v489_v24 = vadd.f32 %v1071_v22, %v908_v44  ;;  %v458_v25 = vpop.f32.mrb[15].mxu0 }
 0x117   :  { %v488_v26 = vadd.f32 %v908_v44, %v458_v25  ;;  %1098 = vmatprep.mubr.msk.f32.mxu1 %vm517_vm4, %v502_v21 }
 0x118   :  { %1099 = vmatmul.mubr.msk.f32.gmra.mrb[12].mxu1 %vm517_vm4, %v503_v23  ;;  %v505_v28 = vmax.f32 %v489_v24, 0.0 }
 0x119   :  { %v504_v27 = vmax.f32 %v488_v26, 0.0 }
 0x11b   :  { %1101 = vmatprep.mubr.msk.f32.mxu1 %vm517_vm4, %v504_v27  ;;  %v727_v27 = vld [vmem:[%s1514_s7] sm:$0x1] }
 0x11c   :  { %1102 = vmatmul.mubr.msk.f32.gmra.mrb[14].mxu1 %vm517_vm4, %v505_v28  ;;  %v734_v28 = vlaneseq }
 0x11d   :  { %1136 = vmatprep.mubr.msk.f32.mxu1 %vm1230_vm5, %v1231_v30 }
 0x11e   :  { %v735_v30 = vshrl.u32 %v734_v28, 7 }
 0x120   :  { %v736_v31 = vsub.s32 0, %v735_v30 }
 0x1d3   :  { %v1082_v34 = vpop.f32.mrb[0].mxu1 }
 0x1d4   :  { %v638_v35 = vadd.f32 %v1082_v34, %v909_v33  ;;  %v632_v36 = vpop.f32.mrb[1].mxu1 }
 0x1d5   :  { %v633_v37 = vadd.f32 %v909_v33, %v632_v36 }
 0x1d6   :  { %v712_v38 = vmax.f32 %v638_v35, 0.0 }
 0x1d7   :  { %v711_v39 = vmax.f32 %v633_v37, 0.0  ;;  %v1085_v40 = vpop.f32.mrb[2].mxu1 }
 0x1d8   :  { %v648_v41 = vadd.f32 %v1085_v40, %v909_v33  ;;  %v642_v42 = vpop.f32.mrb[3].mxu1 }
 0x1d9   :  { %v1152_v44 = vpack.c.bf16 %v712_v38, %v711_v39  ;;  %v643_v45 = vadd.f32 %v909_v33, %v642_v42 }
 0x1da   :  { %v714_v46 = vmax.f32 %v648_v41, 0.0 }
 0x1db   :  { %v713_v47 = vmax.f32 %v643_v45, 0.0  ;;  %v1088_v48 = vpop.f32.mrb[4].mxu1  ;;  %1154 = vmatpush3.bf16.xpose.msk.msra.mxu1 %vm1464_vm6, %v1152_v44 }
 0x1dc   :  { %v658_v49 = vadd.f32 %v1088_v48, %v909_v33  ;;  %v652_v50 = vpop.f32.mrb[5].mxu1  ;;  %1155 = vmatprep.subr.bf16.mxu1 %v1229_v29 }
 0x1dd   :  { %v1156_v51 = vpack.c.bf16 %v714_v46, %v713_v47  ;;  %v653_v52 = vadd.f32 %v909_v33, %v652_v50 }
 0x1de   :  { %v716_v53 = vmax.f32 %v658_v49, 0.0 }
 0x1df   :  { %v715_v54 = vmax.f32 %v653_v52, 0.0  ;;  %v1091_v55 = vpop.f32.mrb[6].mxu1 }
 0x1e0   :  { %v668_v56 = vadd.f32 %v1091_v55, %v909_v33  ;;  %v662_v57 = vpop.f32.mrb[7].mxu1 }
 0x1e1   :  { %v1160_v58 = vpack.c.bf16 %v716_v53, %v715_v54  ;;  %v663_v59 = vadd.f32 %v909_v33, %v662_v57 }
 0x1e2   :  { %v718_v60 = vmax.f32 %v668_v56, 0.0 }
 0x1e3   :  { %v717_v61 = vmax.f32 %v663_v59, 0.0  ;;  %v1094_v62 = vpop.f32.mrb[8].mxu1  ;;  %1158 = vmatpush3.bf16.xpose.msk.msra.mxu1 %vm1464_vm6, %v1156_v51 }
 0x1e4   :  { %v678_v63 = vadd.f32 %v1094_v62, %v909_v33  ;;  %v672_v0 = vpop.f32.mrb[9].mxu1  ;;  %1159 = vmatprep.subr.bf16.mxu1 %v1229_v29 }
 0x1e5   :  { %v1164_v1 = vpack.c.bf16 %v718_v60, %v717_v61  ;;  %v673_v2 = vadd.f32 %v909_v33, %v672_v0 }
 0x1e6   :  { %v720_v3 = vmax.f32 %v678_v63, 0.0 }
 0x1e7   :  { %v719_v4 = vmax.f32 %v673_v2, 0.0  ;;  %v1097_v5 = vpop.f32.mrb[10].mxu1 }
 0x1e8   :  { %v688_v6 = vadd.f32 %v1097_v5, %v909_v33  ;;  %v682_v7 = vpop.f32.mrb[11].mxu1 }
 0x1e9   :  { %v1168_v8 = vpack.c.bf16 %v720_v3, %v719_v4  ;;  %v683_v9 = vadd.f32 %v909_v33, %v682_v7 }
 0x1ea   :  { %v722_v10 = vmax.f32 %v688_v6, 0.0 }
 0x1eb   :  { %v721_v11 = vmax.f32 %v683_v9, 0.0  ;;  %v1100_v12 = vpop.f32.mrb[12].mxu1  ;;  %1162 = vmatpush3.bf16.xpose.msk.msra.mxu1 %vm1464_vm6, %v1160_v58 }
 0x1ec   :  { %v698_v13 = vadd.f32 %v1100_v12, %v909_v33  ;;  %v692_v14 = vpop.f32.mrb[13].mxu1  ;;  %1163 = vmatprep.subr.bf16.mxu1 %v1229_v29 }
 0x1ed   :  { %v1172_v15 = vpack.c.bf16 %v722_v10, %v721_v11  ;;  %v693_v16 = vadd.f32 %v909_v33, %v692_v14 }
 0x1ee   :  { %v724_v17 = vmax.f32 %v698_v13, 0.0 }
 0x1ef   :  { %v723_v18 = vmax.f32 %v693_v16, 0.0  ;;  %v1103_v19 = vpop.f32.mrb[14].mxu1 }
 0x1f0   :  { %v708_v20 = vadd.f32 %v1103_v19, %v909_v33  ;;  %v702_v21 = vpop.f32.mrb[15].mxu1 }
 0x1f1   :  { %v1176_v22 = vpack.c.bf16 %v724_v17, %v723_v18  ;;  %v703_v23 = vadd.f32 %v909_v33, %v702_v21  ;;  %v737_v33 = vrot.slane %v732_v32, %v736_v31 }
 0x1f2   :  { %v726_v24 = vmax.f32 %v708_v20, 0.0 }
 0x1f3   :  { %v725_v25 = vmax.f32 %v703_v23, 0.0  ;;  %1166 = vmatpush3.bf16.xpose.msk.msra.mxu1 %vm1464_vm6, %v1164_v1 }
 0x1f4   :  { %1167 = vmatprep.subr.bf16.mxu1 %v1229_v29 }
 0x1f5   :  { %v1180_v26 = vpack.c.bf16 %v726_v24, %v725_v25 }
 0x1fb   :  { %1170 = vmatpush3.bf16.xpose.msk.msra.mxu1 %vm1464_vm6, %v1168_v8 }
 0x1fc   :  { %1171 = vmatprep.subr.bf16.mxu1 %v1229_v29 }
 0x203   :  { %1174 = vmatpush3.bf16.xpose.msk.msra.mxu1 %vm1464_vm6, %v1172_v15 }
 0x204   :  { %1175 = vmatprep.subr.bf16.mxu1 %v1229_v29 }
 0x20b   :  { %1178 = vmatpush3.bf16.xpose.msk.msra.mxu1 %vm1464_vm6, %v1176_v22 }
 0x20c   :  { %1179 = vmatprep.subr.bf16.mxu1 %v1229_v29 }
 0x213   :  { %1182 = vmatpush3.bf16.xpose.msk.msra.mxu1 %vm1464_vm6, %v1180_v26 }
 0x21a   :  { %1137 = vmatmul.mubr.msk.f32.vlgmr.msra.gmra.mrb[16].mxu1 %vm517_vm4, %v727_v27 }
 0x2ed   :  { %v855_v34 = vpop.f32.mrb[16].mxu1 }
 0x2ee   :  { %v856_v35 = vadd.f32 %v855_v34, %v737_v33  ;;  %v1138_v36 = vpop.f32.mrb[17].mxu1 }
 0x2f0   :  { %859 = vst [vmem:[#allocation3] sm:$0x1] %v856_v35 }
 0x2f1   :  { %1216 = shalt.err (!%p1213_p4)
}
 0x2f2   :  { %s1217_s22 = scalar_lea.hbm %s1516_s9, 16 }
 0x2f3   :  { %p1218_p5 = scmp.ne.s32.totalorder %s1516_s9, %s1217_s22  ;;  %p1221_p6 = scmp.lt.u32.totalorder %s1217_s22, %s1516_s9 }
 0x2f5   :  { %p1223_p7 = pnand %p1221_p6, %p1218_p5 }
 0x2f7   :  { %1226 = shalt.err (!%p1223_p7)
}
 0x2f8   :  { %869 = dma.vmem_to_hbm [thread:$0]  %s867_s19, 16, %s1516_s9, [#allocation4]  }
 0x2f9   :  { %1227 = dma.done.wait [#allocation4], 16  }
 0x2fa   :  { %1228 = vsyncadd [#allocation4], 4294967280 }
 0x2fb   :  { %873 = vsyncpa [#allocation4], 1 }

</bundles_post_ra>
